<compile_context>
chip_gen: v6e
topology: v6e:2x2x1
jax: 0.10.0
libtpu: 0.0.40
codegen_flags: <defaults>
</compile_context>

<pallas_src>
import jax
import jax.numpy as jnp
from jax.experimental import pallas as pl
from jax.experimental.pallas import tpu as pltpu

_LANE = 128
_SUB = 8
_TILE_ROWS_MAX = 8192            # 8192*128*4B = 4 MiB per f32 input block
_VMEM_LIMIT = 48 * 1024 * 1024   # <= ~56 MiB headroom even on v7x (64 MiB VMEM)
# TODO(synk): raise to ~256K elements in production; kept tiny here so the
# small __main__ shapes still exercise the Pallas kernel path.
_XLA_FASTPATH_MAX = 512


def _round_up(x, m):
    return (x + m - 1) // m * m


def _make_kernel(num_blocks, tile_rows, rows_valid_last):
    # Static (trace-time) decision: does the last block run past the array?
    needs_mask = rows_valid_last < tile_rows

    def kernel(x1_ref, x2_ref, out_ref, acc_ref):
        k = pl.program_id(0)

        @pl.when(k == 0)
        def _init():
            acc_ref[...] = jnp.zeros_like(acc_ref)

        # Upcast in-kernel; accumulator stays f32. Divide has plenty of slack
        # under the DMA-bound loop.
        q = x1_ref[...].astype(jnp.float32) / x2_ref[...].astype(jnp.float32)

        if needs_mask:
            @pl.when(k != num_blocks - 1)
            def _steady():
                # Fold (tile_rows, 128) -> (8, 128) with pure VPU vreg adds.
                acc_ref[...] += q.reshape(-1, _SUB, _LANE).sum(axis=0)

            @pl.when(k == num_blocks - 1)
            def _tail():
                # Mask the quotient (not the inputs) so garbage rows beyond
                # the array edge (even 0/0 NaN) never reach the sum.
                row = jax.lax.broadcasted_iota(jnp.int32, q.shape, 0)
                qm = jnp.where(row < rows_valid_last, q, 0.0)
                acc_ref[...] += qm.reshape(-1, _SUB, _LANE).sum(axis=0)
        else:
            acc_ref[...] += q.reshape(-1, _SUB, _LANE).sum(axis=0)

        @pl.when(k == num_blocks - 1)
        def _finalize():
            # Single cross-lane/cross-sublane (XLU) reduction for the kernel.
            out_ref[0, 0] = jnp.sum(acc_ref[...])

    return kernel


def custom_loss(x_1, x_2, target=None, *, tile_rows_max=_TILE_ROWS_MAX):
    del target  # unused by the reference module
    out_dtype = jnp.promote_types(x_1.dtype, x_2.dtype)

    x1 = x_1.reshape(-1)
    x2 = x_2.reshape(-1)
    n = x1.size  # static Python int at trace time

    # Tiny inputs: kernel launch + grid fixed cost dominates; let XLA fuse it.
    if n <= _XLA_FASTPATH_MAX:
        return jnp.sum(x1.astype(jnp.float32) / x2.astype(jnp.float32)).astype(out_dtype)

    rows_full = n // _LANE
    rem = n - rows_full * _LANE

    tail = jnp.float32(0.0)
    if rem:
        # Ragged (<128 element) tail handled by XLA; kernel gets the aligned prefix.
        tail = jnp.sum(x1[rows_full * _LANE:].astype(jnp.float32)
                       / x2[rows_full * _LANE:].astype(jnp.float32))
        # TODO(synk): the prefix slice below may still materialize a copy in XLA;
        # a fully copy-free ragged path needs memory_space=pl.ANY + manual DMA.
        x1 = x1[: rows_full * _LANE]
        x2 = x2[: rows_full * _LANE]

    # Lane-dense (rows, 128) slab; contiguous reshape is free in XLA.
    x1 = x1.reshape(rows_full, _LANE)
    x2 = x2.reshape(rows_full, _LANE)

    tile_rows = min(_round_up(tile_rows_max, _SUB), _round_up(rows_full, _SUB))
    num_blocks = pl.cdiv(rows_full, tile_rows)
    rows_valid_last = rows_full - (num_blocks - 1) * tile_rows

    kernel = _make_kernel(num_blocks, tile_rows, rows_valid_last)

    out = pl.pallas_call(
        kernel,
        out_shape=jax.ShapeDtypeStruct((1, 1), jnp.float32),
        grid_spec=pltpu.PrefetchScalarGridSpec(
            num_scalar_prefetch=0,
            grid=(num_blocks,),
            in_specs=[
                pl.BlockSpec((tile_rows, _LANE), lambda k: (k, 0)),
                pl.BlockSpec((tile_rows, _LANE), lambda k: (k, 0)),
            ],
            out_specs=pl.BlockSpec(
                (1, 1), lambda k: (0, 0),
                memory_space=pltpu.MemorySpace.SMEM,
            ),
            scratch_shapes=[pltpu.VMEM((_SUB, _LANE), jnp.float32)],
        ),
        compiler_params=pltpu.CompilerParams(
            dimension_semantics=("arbitrary",),
            vmem_limit_bytes=_VMEM_LIMIT,
        ),
    )(x1, x2)

    return (out[0, 0] + tail).astype(out_dtype)


def _check(result, a, b):
    ref = jnp.sum(a / b)
    scale = jnp.sum(jnp.abs(a / b)) + 1.0  # scale-aware tolerance for f32 sums
    assert jnp.abs(result - ref) <= 1e-5 * scale, (result, ref)


if __name__ == "__main__":
    key = jax.random.PRNGKey(0)
    k1, k2, k3, k4, k5 = jax.random.split(key, 5)

    # Primary small-shape test: (2,4,16,16) = 2048 elems, single-block kernel path.
    x_1 = jax.random.normal(k1, (2, 4, 16, 16), dtype=jnp.float32)
    x_2 = jax.random.uniform(k2, (2, 4, 16, 16), dtype=jnp.float32,
                             minval=0.5, maxval=2.0)   # keep denominator away from 0
    target = jax.random.normal(k3, (2, 4, 16, 16), dtype=jnp.float32)  # unused

    result = jax.block_until_ready(custom_loss(x_1, x_2, target))
    _check(result, x_1, x_2)

    # Ragged-n test (n % 128 != 0): kernel on aligned prefix + XLA tail + row mask.
    y_1 = jax.random.normal(k4, (2, 5, 13, 11), dtype=jnp.float32)
    y_2 = jax.random.uniform(k5, (2, 5, 13, 11), dtype=jnp.float32,
                             minval=0.5, maxval=2.0)
    r2 = jax.block_until_ready(custom_loss(y_1, y_2, y_1))
    _check(r2, y_1, y_2)

    # Multi-block test (small tile override): exercises accumulator init /
    # steady-state / masked-last-block / finalize across a 5-step grid.
    z_1 = jax.random.normal(k1, (4, 9, 16, 16), dtype=jnp.float32)      # 9216 elems
    z_2 = jax.random.uniform(k2, (4, 9, 16, 16), dtype=jnp.float32,
                             minval=0.5, maxval=2.0)
    r3 = jax.block_until_ready(custom_loss(z_1, z_2, None, tile_rows_max=16))
    _check(r3, z_1, z_2)

    print("KERNEL_OK")
</pallas_src>

<mosaic_0001>
module attributes {stable_mosaic.version = 11 : i64} {
  func.func @kernel(%arg0: i32, %arg1: memref<16x128xf32, #tpu.memory_space<vmem>>, %arg2: memref<16x128xf32, #tpu.memory_space<vmem>>, %arg3: memref<1x1xf32, #tpu.memory_space<smem>>, %arg4: memref<8x128xf32, #tpu.memory_space<vmem>>) attributes {dimension_semantics = [#tpu.dimension_semantics<arbitrary>], iteration_bounds = array<i64: 1>, scalar_prefetch = 0 : i64, scratch_operands = 1 : i64, tpu.core_type = #tpu.core_type<tc>, window_params = [{transform_indices = @transform_0, window_bounds = array<i64: 16, 128>}, {transform_indices = @transform_1, window_bounds = array<i64: 16, 128>}, {transform_indices = @transform_2, window_bounds = array<i64: 1, 1>}]} {
    %c0_i32 = arith.constant 0 : i32
    %0 = arith.cmpi eq, %arg0, %c0_i32 : i32
    %1 = arith.extui %0 : i1 to i32
    %c0_i32_0 = arith.constant 0 : i32
    %2 = arith.cmpi ne, %1, %c0_i32_0 : i32
    scf.if %2 {
      %cst_10 = arith.constant 0.000000e+00 : f32
      %14 = vector.broadcast %cst_10 : f32 to vector<8x128xf32>
      %c0_11 = arith.constant 0 : index
      %c0_12 = arith.constant 0 : index
      %15 = vector.load %arg4[%c0_11, %c0_12] : memref<8x128xf32, #tpu.memory_space<vmem>>, vector<8x128xf32>
      tpu.vector_store %arg4[%c0_11, %c0_12], %14 {strides = array<i32>} : memref<8x128xf32, #tpu.memory_space<vmem>>, vector<8x128xf32>,
    } else {
    }
    %c0 = arith.constant 0 : index
    %c0_1 = arith.constant 0 : index
    %3 = vector.load %arg1[%c0, %c0_1] : memref<16x128xf32, #tpu.memory_space<vmem>>, vector<16x128xf32>
    %c0_2 = arith.constant 0 : index
    %c0_3 = arith.constant 0 : index
    %4 = vector.load %arg2[%c0_2, %c0_3] : memref<16x128xf32, #tpu.memory_space<vmem>>, vector<16x128xf32>
    %5 = arith.divf %3, %4 : vector<16x128xf32>
    %c0_4 = arith.constant 0 : index
    %c0_5 = arith.constant 0 : index
    %6 = vector.load %arg4[%c0_4, %c0_5] : memref<8x128xf32, #tpu.memory_space<vmem>>, vector<8x128xf32>
    %7 = vector.shape_cast %5 : vector<16x128xf32> to vector<2x8x128xf32>
    %cst = arith.constant dense<0.000000e+00> : vector<8x128xf32>
    %8 = vector.multi_reduction <add>, %7, %cst [0] : vector<2x8x128xf32> to vector<8x128xf32>
    %9 = arith.addf %6, %8 : vector<8x128xf32>
    %c0_6 = arith.constant 0 : index
    %c0_7 = arith.constant 0 : index
    %10 = vector.load %arg4[%c0_6, %c0_7] : memref<8x128xf32, #tpu.memory_space<vmem>>, vector<8x128xf32>
    tpu.vector_store %arg4[%c0_6, %c0_7], %9 {strides = array<i32>} : memref<8x128xf32, #tpu.memory_space<vmem>>, vector<8x128xf32>,
    %c0_i32_8 = arith.constant 0 : i32
    %11 = arith.cmpi eq, %arg0, %c0_i32_8 : i32
    %12 = arith.extui %11 : i1 to i32
    %c0_i32_9 = arith.constant 0 : i32
    %13 = arith.cmpi ne, %12, %c0_i32_9 : i32
    scf.if %13 {
      %c0_10 = arith.constant 0 : index
      %c0_11 = arith.constant 0 : index
      %14 = vector.load %arg4[%c0_10, %c0_11] : memref<8x128xf32, #tpu.memory_space<vmem>>, vector<8x128xf32>
      %15 = vector.shape_cast %14 : vector<8x128xf32> to vector<1x8x128xf32>
      %cst_12 = arith.constant dense<0.000000e+00> : vector<1xf32>
      %16 = vector.multi_reduction <add>, %15, %cst_12 [1, 2] : vector<1x8x128xf32> to vector<1xf32>
      %17 = vector.shape_cast %16 : vector<1xf32> to vector<1x1x1xf32>
      %18 = vector.extract %17[0, 0, 0] : f32 from vector<1x1x1xf32>
      %c0_13 = arith.constant 0 : index
      %c0_14 = arith.constant 0 : index
      %19 = memref.load %arg3[%c0_13, %c0_14] : memref<1x1xf32, #tpu.memory_space<smem>>
      memref.store %18, %arg3[%c0_13, %c0_14] : memref<1x1xf32, #tpu.memory_space<smem>>
    } else {
    }
    return
  }
  func.func @transform_0(%arg0: i32) -> (i32, i32) {
    %c0_i32 = arith.constant 0 : i32
    %c0_i32_0 = arith.constant 0 : i32
    return %arg0, %c0_i32 : i32, i32
  }
  func.func @transform_1(%arg0: i32) -> (i32, i32) {
    %c0_i32 = arith.constant 0 : i32
    %c0_i32_0 = arith.constant 0 : i32
    return %arg0, %c0_i32 : i32, i32
  }
  func.func @transform_2(%arg0: i32) -> (i32, i32) {
    %c0_i32 = arith.constant 0 : i32
    %c0_i32_0 = arith.constant 0 : i32
    %c0_i32_1 = arith.constant 0 : i32
    return %c0_i32, %c0_i32_0 : i32, i32
  }
}

</mosaic_0001>

<bundles_post_ra>
// kernel: tpu_custom_call.1
= control target key start
LH: loop header
LB: loop body
LE: loop exit
PB: predicated region body
PF: predicated region fallthrough
CT: control target
= control target key end

     0   :  { %7 = vsyncpa [#allocation4], 0  ;;  %s181_s0 = inlined_call_operand.hbm [shape: f32[16,128], index: 0, kind: input, shape index: {}]   ;;  %s182_s1 = inlined_call_operand.hbm [shape: f32[16,128], index: 1, kind: input, shape index: {}]   ;;  %s183_s2 = inlined_call_operand.hbm [shape: f32[1,1], index: 2, kind: output, shape index: {}]  }
   0x1   :  { %8 = vsyncpa [#allocation7], 0 }
   0x2   :  { %9 = vsyncpa [#allocation5], 0  ;;  %s152_s9 = smov [#allocation3]  }
   0x3   :  { %s15_s10 = sshll.u32 %s152_s9, 4  ;;  %s16_s10 = int_to_ptr.vmem [resolvable:$true] %s15_s10 }
   0x4   :  { %s106_s11 = scalar_lea.vmem %s16_s10, 256  ;;  %p111_p1 = scmp.lt.s32.totalorder %s16_s10, %s16_s10 }
   0x5   :  { %p107_p0 = scmp.ne.s32.totalorder %s16_s10, %s106_s11  ;;  %p112_p2 = scmp.lt.s32.totalorder %s106_s11, %s106_s11 }
   0x7   :  { %p113_p3 = por %p112_p2, %p111_p1 }
   0x9   :  { %p114_p4 = pnand %p113_p3, %p107_p0 }
   0xb   :  { %117 = shalt.err (!%p114_p4)
}
   0xc   :  { %s153_s12 = smov 128   ;;  %s154_s13 = smov 8  }
   0xd   :  { %21 = dma.hbm_to_vmem [thread:$0]  %s181_s0, 256, %s16_s10, [#allocation4], %s153_s12, %s153_s12, %s154_s13  }
   0xe   :  { %s155_s16 = smov [#allocation6]  }
   0xf   :  { %s27_s17 = sshll.u32 %s155_s16, 4  ;;  %s28_s17 = int_to_ptr.vmem [resolvable:$true] %s27_s17 }
  0x10   :  { %s126_s18 = scalar_lea.vmem %s28_s17, 256  ;;  %p131_p6 = scmp.lt.s32.totalorder %s28_s17, %s28_s17 }
  0x11   :  { %p127_p5 = scmp.ne.s32.totalorder %s28_s17, %s126_s18  ;;  %p132_p7 = scmp.lt.s32.totalorder %s126_s18, %s126_s18 }
  0x13   :  { %p133_p8 = por %p132_p7, %p131_p6 }
  0x15   :  { %p134_p9 = pnand %p133_p8, %p127_p5 }
  0x17   :  { %137 = shalt.err (!%p134_p9)
}
  0x18   :  { %33 = dma.hbm_to_vmem [thread:$0]  %s182_s1, 256, %s28_s17, [#allocation7], %s153_s12, %s153_s12, %s154_s13  }
  0x19   :  { %146 = dma.done.wait [#allocation4], 256  }
  0x1a   :  { %147 = vsyncadd [#allocation4], 4294967040 }
  0x1b   :  { %148 = dma.done.wait [#allocation7], 256  }
  0x1c   :  { %149 = vsyncadd [#allocation7], 4294967040  ;;  %v47_v0 = vld [vmem:[#allocation6] sm:$0xff]  ;;  %v48_v1 = vld [vmem:[#allocation6 + $0x8] sm:$0xff]  ;;  %s156_s1 = smov [#allocation8]  }
  0x1d   :  { %94 = vrcp.f32 %v47_v0  ;;  %v45_v2 = vld [vmem:[#allocation3] sm:$0xff]  ;;  %v46_v3 = vld [vmem:[#allocation3 + $0x8] sm:$0xff] }
  0x1e   :  { %96 = vrcp.f32 %v48_v1 }
  0x2a   :  { %v95_v4 = vpop.eup %94 }
  0x2b   :  { %v97_v5 = vpop.eup %96  ;;  %v50_v6 = vmul.f32 %v95_v4, %v45_v2 }
  0x2c   :  { %v52_v7 = vmul.f32 %v97_v5, %v46_v3 }
  0x2e   :  { %v54_v8 = vadd.f32 %v52_v7, %v50_v6 }
  0x30   :  { %61 = vadd.xlane.f32.xlu0 %v54_v8 }
  0xb9   :  { %v62_v9 = vpop.xlane.xlu0 %61 }
  0xba   :  { %v63_v10 = vrot.slane %v62_v9, 4 }
  0xbc   :  { %v64_v11 = vadd.f32 %v63_v10, %v62_v9 }
  0xbe   :  { %v65_v12 = vrot.slane %v64_v11, 2 }
  0xc0   :  { %v66_v13 = vadd.f32 %v65_v12, %v64_v11 }
  0xc2   :  { %v67_v14 = vrot.slane %v66_v13, 1 }
  0xc4   :  { %v68_v15 = vadd.f32 %v67_v14, %v66_v13 }
  0xc6   :  { %87 = vpush %v68_v15 }
  0xf7   :  { %s88_s0 = spop %87 }
  0xf8   :  { %71 = sst [smem:[#allocation8]] %s88_s0 }
  0xf9   :  { %79 = dma.smem_to_hbm %s156_s1, 16, %s183_s2, [#allocation5]  }
  0xfa   :  { %150 = dma.done.wait [#allocation5], 16  }
  0xfb   :  { %151 = vsyncadd [#allocation5], 4294967280 }
  0xfc   :  { %83 = sfence }
  0xfd   :  { %84 = vsyncpa [#allocation4], 1 }
  0xfe   :  { %85 = vsyncpa [#allocation7], 1 }
  0xff   :  { %86 = vsyncpa [#allocation5], 1 }

</bundles_post_ra>
